<compile_context>
chip_gen: v7x
topology: tpu7x:2x2x1
jax: 0.10.0
libtpu: 0.0.40
codegen_flags: <defaults>
</compile_context>

<pallas_src>
import functools

import jax
import jax.numpy as jnp
from jax import lax
from jax.experimental import pallas as pl
from jax.experimental.pallas import tpu as pltpu


def _round_up(x, m):
    return ((x + m - 1) // m) * m


def _vmem_capacity_bytes():
    """Per-core VMEM of the actual chip (v7x=64MiB, v5e/v6e=128MiB)."""
    try:
        cap = int(pltpu.get_tpu_info().vmem_capacity_bytes)
        if cap > 0:
            return cap
    except Exception:
        pass
    return 64 << 20  # conservative fallback = v7x


def _embedding_onehot_kernel(ids_ref, emb_ref, out_ref, *, vocab_chunk, precision):
    """One grid step: ids tile (T, 1) -> dense (T, Ep) output tile.

    Lookup = one_hot(ids) @ table on the MXU, chunked over the vocab axis so
    the (T, chunk) one-hot intermediate stays vreg-friendly and the VALU
    one-hot build of chunk k+1 overlaps the vmatmul of chunk k.
    """
    t, ep = out_ref.shape
    vp = emb_ref.shape[0]
    ids = ids_ref[...]                                              # (T, 1) int32

    acc = jnp.zeros((t, ep), jnp.float32)
    for c in range(vp // vocab_chunk):                              # static trip count
        base = c * vocab_chunk
        iota = base + lax.broadcasted_iota(jnp.int32, (t, vocab_chunk), 1)
        one_hot = (iota == ids).astype(emb_ref.dtype)               # exact 0/1
        acc = acc + jnp.dot(
            one_hot,
            emb_ref[pl.ds(base, vocab_chunk), :],
            preferred_element_type=jnp.float32,
            precision=precision,
        )
    out_ref[...] = acc.astype(out_ref.dtype)                        # single lane-dense store


def word_embedding(ids, emb_table, *, tokens_per_block=None):
    """Equivalent of `torch.nn.Embedding(V, E, padding_idx=1)(ids)` forward.

    Note: ids outside [0, V) yield all-zero rows (torch raises instead).
    """
    B, S = ids.shape
    V, E = emb_table.shape
    N = B * S

    out_dtype = emb_table.dtype
    itemsize = jnp.dtype(emb_table.dtype).itemsize

    # ---- padded geometry -------------------------------------------------
    Ep = _round_up(E, 128)                    # lane-aligned output -> unmasked vst
    vocab_chunk = 128 if V <= 128 else 256    # MXU K (128 native on v5e, 256 on v6e/v7x)
    Vp = _round_up(V, vocab_chunk)            # one-hot lane axis / matmul K

    # Token tile: tiny inputs -> one minimally padded step; big inputs -> ~1 MiB tiles.
    n_tokens8 = _round_up(N, 8)
    if tokens_per_block is None:
        target = _round_up(max((1 << 20) // max(Ep * itemsize, 1), 8), 8)
        T = int(min(n_tokens8, max(64, min(target, 1024))))
    else:
        T = int(min(n_tokens8, _round_up(int(tokens_per_block), 8)))
    T = max(T, 8)
    Np = _round_up(N, T)

    # ---- generation-aware VMEM budget -------------------------------------
    budget = int(0.75 * _vmem_capacity_bytes())
    table_bytes = Vp * Ep * itemsize                        # single-buffered resident table
    tile_bytes = 2 * T * Ep * itemsize + 2 * T * 4          # double-buffered out + ids tiles
    scratch_bytes = T * (vocab_chunk + Ep) * 4              # one-hot chunk + f32 accumulator
    vmem_need = table_bytes + tile_bytes + scratch_bytes + (2 << 20)

    if vmem_need > budget:
        # TODO(synk): HBM-resident table (memory_space=pl.ANY) with scalar-prefetched ids
        # driving double-buffered per-row DMA gather; until then defer to XLA's gather.
        return jnp.take(emb_table, ids.astype(jnp.int32), axis=0)

    vmem_limit = int(min(max(vmem_need, 32 << 20), budget))

    # ---- operands ----------------------------------------------------------
    ids_flat = ids.reshape(N).astype(jnp.int32)             # no clip: OOB id -> zero row
    if Np != N:
        ids_flat = jnp.pad(ids_flat, (0, Np - N), constant_values=1)
    ids_col = ids_flat.reshape(Np, 1)

    table = emb_table
    if (Vp, Ep) != (V, E):
        table = jnp.pad(emb_table, ((0, Vp - V), (0, Ep - E)))

    # f32 needs the exact multi-pass MXU decomposition; bf16 one-hot is exact as-is.
    precision = (lax.Precision.HIGHEST if emb_table.dtype == jnp.float32
                 else lax.Precision.DEFAULT)
    kernel = functools.partial(_embedding_onehot_kernel,
                               vocab_chunk=vocab_chunk, precision=precision)

    def _call(table_spec):
        return pl.pallas_call(
            kernel,
            out_shape=jax.ShapeDtypeStruct((Np, Ep), out_dtype),
            grid_spec=pltpu.PrefetchScalarGridSpec(
                num_scalar_prefetch=0,
                grid=(Np // T,),
                in_specs=[
                    pl.BlockSpec((T, 1), lambda t_: (t_, 0)),   # ids tile
                    table_spec,                                  # resident table
                ],
                out_specs=pl.BlockSpec((T, Ep), lambda t_: (t_, 0)),
            ),
            # TODO(synk): on v7x use pltpu.CORE_PARALLEL (or pl.core_map over a 2-TC
            # mesh) on the token axis; plain "parallel" cannot be gated safely here
            # without reliable chip detection, so it stays the portable default.
            compiler_params=pltpu.CompilerParams(
                dimension_semantics=("parallel",),
                vmem_limit_bytes=vmem_limit),
        )(ids_col, table)

    try:
        # Single-buffer the table: its index_map is constant, so double buffering
        # only wastes VMEM and halves the resident-table cutoff (worst on v7x).
        out_flat = _call(pl.BlockSpec((Vp, Ep), lambda t_: (0, 0),
                                      pipeline_mode=pl.Buffered(1)))
    except Exception:
        out_flat = _call(pl.BlockSpec((Vp, Ep), lambda t_: (0, 0)))

    if (Np, Ep) != (N, E):
        out_flat = out_flat[:N, :E]
    return out_flat.reshape(B, S, E)


if __name__ == "__main__":
    key = jax.random.PRNGKey(0)

    # --- Case 1: shapes consistent with the module (vocab=64, emb=128, B=2, S=8).
    VOCAB, EMB = 64, 128
    B, S = 2, 8
    k_emb, k_ids, k_emb2, k_ids2 = jax.random.split(key, 4)

    # nn.Embedding default init ~ N(0, 1); padding_idx=1 row is zeroed at init.
    emb_table = jax.random.normal(k_emb, (VOCAB, EMB), dtype=jnp.float32)
    emb_table = emb_table.at[1].set(0.0)
    ids = jax.random.randint(k_ids, (B, S), 0, VOCAB, dtype=jnp.int32)
    ids = ids.at[0, 0].set(1)                 # make sure padding_idx appears

    out = jax.block_until_ready(word_embedding(ids, emb_table))
    ref = emb_table[ids]
    assert out.shape == (B, S, EMB)
    assert jnp.allclose(out, ref), "mismatch vs reference embedding lookup (case 1)"

    # --- Case 2: exercises token / vocab / emb-dim padding paths.
    V2, E2, B2, S2 = 50, 96, 3, 5
    emb2 = jax.random.normal(k_emb2, (V2, E2), dtype=jnp.float32)
    emb2 = emb2.at[1].set(0.0)
    ids2 = jax.random.randint(k_ids2, (B2, S2), 0, V2, dtype=jnp.int32)

    out2 = jax.block_until_ready(word_embedding(ids2, emb2))
    ref2 = emb2[ids2]
    assert out2.shape == (B2, S2, E2)
    assert jnp.allclose(out2, ref2), "mismatch vs reference embedding lookup (case 2)"

    print("KERNEL_OK")
</pallas_src>

<mosaic_0001>
module attributes {stable_mosaic.version = 11 : i64} {
  func.func @_embedding_onehot_kernel(%arg0: i32, %arg1: memref<16x1xi32, #tpu.memory_space<vmem>>, %arg2: memref<128x128xf32, #tpu.memory_space<vmem>>, %arg3: memref<16x128xf32, #tpu.memory_space<vmem>>) attributes {dimension_semantics = [#tpu.dimension_semantics<parallel>], iteration_bounds = array<i64: 1>, scalar_prefetch = 0 : i64, scratch_operands = 0 : i64, tpu.core_type = #tpu.core_type<tc>, window_params = [{transform_indices = @transform_0, window_bounds = array<i64: 16, 1>}, {pipeline_mode = #tpu.pipeline_mode<synchronous>, transform_indices = @transform_1, window_bounds = array<i64: 128, 128>}, {transform_indices = @transform_2, window_bounds = array<i64: 16, 128>}]} {
    %c0 = arith.constant 0 : index
    %c0_0 = arith.constant 0 : index
    %0 = vector.load %arg1[%c0, %c0_0] : memref<16x1xi32, #tpu.memory_space<vmem>>, vector<16x1xi32>
    %cst = arith.constant 0.000000e+00 : f32
    %1 = vector.broadcast %cst : f32 to vector<16x128xf32>
    %2 = tpu.iota {dimensions = array<i32: 1>} : vector<16x128xi32>
    %c0_i32 = arith.constant 0 : i32
    %3 = vector.broadcast %c0_i32 : i32 to vector<16x128xi32>
    %4 = arith.addi %3, %2 : vector<16x128xi32>
    %5 = vector.broadcast %0 : vector<16x1xi32> to vector<16x128xi32>
    %6 = arith.cmpi eq, %4, %5 : vector<16x128xi32>
    %7 = arith.extui %6 : vector<16x128xi1> to vector<16x128xi32>
    %8 = arith.sitofp %7 : vector<16x128xi32> to vector<16x128xf32>
    %c0_1 = arith.constant 0 : index
    %c0_2 = arith.constant 0 : index
    %9 = vector.load %arg2[%c0_1, %c0_2] : memref<128x128xf32, #tpu.memory_space<vmem>>, vector<128x128xf32>
    %cst_3 = arith.constant dense<0.000000e+00> : vector<16x128xf32>
    %10 = tpu.matmul %8, %9, %cst_3 {dimension_numbers = #tpu.dot_dimension_numbers<[1], [0], [0], [1], [0, 0, 1, 1], [], []>, precision = #tpu.contract_precision<fp32>} : vector<16x128xf32>, vector<128x128xf32>, vector<16x128xf32> -> vector<16x128xf32>
    %11 = arith.addf %1, %10 : vector<16x128xf32>
    %c0_4 = arith.constant 0 : index
    %c0_5 = arith.constant 0 : index
    %12 = vector.load %arg3[%c0_4, %c0_5] : memref<16x128xf32, #tpu.memory_space<vmem>>, vector<16x128xf32>
    tpu.vector_store %arg3[%c0_4, %c0_5], %11 {strides = array<i32>} : memref<16x128xf32, #tpu.memory_space<vmem>>, vector<16x128xf32>,
    return
  }
  func.func @transform_0(%arg0: i32) -> (i32, i32) {
    %c0_i32 = arith.constant 0 : i32
    %c0_i32_0 = arith.constant 0 : i32
    return %arg0, %c0_i32 : i32, i32
  }
  func.func @transform_1(%arg0: i32) -> (i32, i32) {
    %c0_i32 = arith.constant 0 : i32
    %c0_i32_0 = arith.constant 0 : i32
    %c0_i32_1 = arith.constant 0 : i32
    return %c0_i32, %c0_i32_0 : i32, i32
  }
  func.func @transform_2(%arg0: i32) -> (i32, i32) {
    %c0_i32 = arith.constant 0 : i32
    %c0_i32_0 = arith.constant 0 : i32
    return %arg0, %c0_i32 : i32, i32
  }
}

module attributes {stable_mosaic.version = 11 : i64} {
  func.func @_embedding_onehot_kernel(%arg0: i32, %arg1: memref<16x1xi32, #tpu.memory_space<vmem>>, %arg2: memref<128x128xf32, #tpu.memory_space<vmem>>, %arg3: memref<16x128xf32, #tpu.memory_space<vmem>>) attributes {dimension_semantics = [#tpu.dimension_semantics<parallel>], iteration_bounds = array<i64: 1>, scalar_prefetch = 0 : i64, scratch_operands = 0 : i64, tpu.core_type = #tpu.core_type<tc>, window_params = [{transform_indices = @transform_0, window_bounds = array<i64: 16, 1>}, {pipeline_mode = #tpu.pipeline_mode<synchronous>, transform_indices = @transform_1, window_bounds = array<i64: 128, 128>}, {transform_indices = @transform_2, window_bounds = array<i64: 16, 128>}]} {
    %c0 = arith.constant 0 : index
    %c0_0 = arith.constant 0 : index
    %0 = vector.load %arg1[%c0, %c0_0] : memref<16x1xi32, #tpu.memory_space<vmem>>, vector<16x1xi32>
    %cst = arith.constant 0.000000e+00 : f32
    %1 = vector.broadcast %cst : f32 to vector<16x128xf32>
    %2 = tpu.iota {dimensions = array<i32: 1>} : vector<16x128xi32>
    %c0_i32 = arith.constant 0 : i32
    %3 = vector.broadcast %c0_i32 : i32 to vector<16x128xi32>
    %4 = arith.addi %3, %2 : vector<16x128xi32>
    %5 = vector.broadcast %0 : vector<16x1xi32> to vector<16x128xi32>
    %6 = arith.cmpi eq, %4, %5 : vector<16x128xi32>
    %7 = arith.extui %6 : vector<16x128xi1> to vector<16x128xi32>
    %8 = arith.sitofp %7 : vector<16x128xi32> to vector<16x128xf32>
    %c0_1 = arith.constant 0 : index
    %c0_2 = arith.constant 0 : index
    %9 = vector.load %arg2[%c0_1, %c0_2] : memref<128x128xf32, #tpu.memory_space<vmem>>, vector<128x128xf32>
    %cst_3 = arith.constant dense<0.000000e+00> : vector<16x128xf32>
    %10 = tpu.matmul %8, %9, %cst_3 {dimension_numbers = #tpu.dot_dimension_numbers<[1], [0], [0], [1], [0, 0, 1, 1], [], []>, precision = #tpu.contract_precision<fp32>} : vector<16x128xf32>, vector<128x128xf32>, vector<16x128xf32> -> vector<16x128xf32>
    %11 = arith.addf %1, %10 : vector<16x128xf32>
    %c0_4 = arith.constant 0 : index
    %c0_5 = arith.constant 0 : index
    %12 = vector.load %arg3[%c0_4, %c0_5] : memref<16x128xf32, #tpu.memory_space<vmem>>, vector<16x128xf32>
    tpu.vector_store %arg3[%c0_4, %c0_5], %11 {strides = array<i32>} : memref<16x128xf32, #tpu.memory_space<vmem>>, vector<16x128xf32>,
    return
  }
  func.func @transform_0(%arg0: i32) -> (i32, i32) {
    %c0_i32 = arith.constant 0 : i32
    %c0_i32_0 = arith.constant 0 : i32
    return %arg0, %c0_i32 : i32, i32
  }
  func.func @transform_1(%arg0: i32) -> (i32, i32) {
    %c0_i32 = arith.constant 0 : i32
    %c0_i32_0 = arith.constant 0 : i32
    %c0_i32_1 = arith.constant 0 : i32
    return %c0_i32, %c0_i32_0 : i32, i32
  }
  func.func @transform_2(%arg0: i32) -> (i32, i32) {
    %c0_i32 = arith.constant 0 : i32
    %c0_i32_0 = arith.constant 0 : i32
    return %arg0, %c0_i32 : i32, i32
  }
}

</mosaic_0001>

<bundles_post_ra>
// kernel: tpu_custom_call.1
= control target key start
LH: loop header
LB: loop body
LE: loop exit
PB: predicated region body
PF: predicated region fallthrough
CT: control target
= control target key end

     0   :  { %7 = vsyncpa [#allocation3], 0  ;;  %s1659_s0 = inlined_call_operand.vmem [shape: s32[16,1], index: 0, kind: input, shape index: {}]   ;;  %s1660_s1 = inlined_call_operand.hbm [shape: f32[128,128], index: 1, kind: input, shape index: {}]   ;;  %s1661_s2 = inlined_call_operand.hbm [shape: f32[16,128], index: 2, kind: output, shape index: {}]  }
   0x1   :  { %8 = vsyncpa [#allocation4], 0  ;;  %s1345_s9 = smov [#allocation2]   ;;  %s1297_s13 = scalar_lea.hbm %s1660_s1, 2048 }
   0x2   :  { %s16_s10 = sshll.u32 %s1345_s9, 4  ;;  %p1298_p0 = scmp.ne.s32.totalorder %s1660_s1, %s1297_s13  ;;  %s17_s10 = int_to_ptr.vmem [resolvable:$true] %s16_s10 }
   0x3   :  { %p1301_p1 = scmp.lt.u32.totalorder %s1297_s13, %s1660_s1 }
   0x5   :  { %p1303_p2 = pnand %p1301_p1, %p1298_p0 }
   0x7   :  { %1306 = shalt.err (!%p1303_p2)
}
   0x8   :  { %s1307_s18 = scalar_lea.vmem %s17_s10, 2048  ;;  %p1312_p4 = scmp.lt.s32.totalorder %s17_s10, %s17_s10 }
   0x9   :  { %p1308_p3 = scmp.ne.s32.totalorder %s17_s10, %s1307_s18  ;;  %p1313_p5 = scmp.lt.s32.totalorder %s1307_s18, %s1307_s18 }
   0xb   :  { %p1314_p6 = por %p1313_p5, %p1312_p4 }
   0xd   :  { %p1315_p7 = pnand %p1314_p6, %p1308_p3 }
   0xf   :  { %1318 = shalt.err (!%p1315_p7)
}
  0x10   :  { %s1346_s19 = smov 128   ;;  %s1347_s20 = smov 8  }
  0x11   :  { %22 = dma.hbm_to_vmem [thread:$0]  %s1660_s1, 2048, %s17_s10, [#allocation3], %s1346_s19, %s1346_s19, %s1347_s20  }
  0x12   :  { %1341 = dma.done.wait [#allocation3], 2048  }
  0x13   :  { %1342 = vsyncadd [#allocation3], 4294965248  ;;  %v1348_v0 = vmov 0   ;;  %v26_v1 = vld [vmem:[%s1659_s0] sm:$0xff]  ;;  %v43_v3 = vld [vmem:[#allocation2 + $0x8] sm:$0xff] }
  0x14   :  { %1296 = vset.pattern.permute.xlu0 %v1348_v0  ;;  %v42_v2 = vld [vmem:[#allocation2] sm:$0xff]  ;;  %v44_v5 = vld [vmem:[#allocation2 + $0x10] sm:$0xff]  ;;  %v45_v6 = vld [vmem:[#allocation2 + $0x18] sm:$0xff]  ;;  %v62_v8 = vand.u32 4294901760, %v43_v3 }
  0x15   :  { %31 = vperm.xlu0 %1296, %v26_v1   ;;  %v59_v4 = vand.u32 4294901760, %v42_v2  ;;  %v27_v7 = vld [vmem:[%s1659_s0 + $0x8] sm:$0xff]  ;;  %v65_v9 = vand.u32 4294901760, %v44_v5  ;;  %v68_v10 = vand.u32 4294901760, %v45_v6  ;;  %v46_v11 = vld [vmem:[#allocation2 + $0x20] sm:$0xff]  ;;  %v48_v17 = vld [vmem:[#allocation2 + $0x30] sm:$0xff] }
  0x16   :  { %v47_v12 = vld [vmem:[#allocation2 + $0x28] sm:$0xff]  ;;  %v71_v15 = vand.u32 4294901760, %v46_v11  ;;  %v49_v18 = vld [vmem:[#allocation2 + $0x38] sm:$0xff]  ;;  %v77_v20 = vand.u32 4294901760, %v48_v17  ;;  %v50_v22 = vld [vmem:[#allocation2 + $0x40] sm:$0xff]  ;;  %v1438_v46 = vsub.f32 %v43_v3, %v62_v8  ;;  %s1351_s0 = smov [#allocation5]  }
  0x17   :  { %v1388_v13 = vpack.c.bf16 %v62_v8, %v59_v4  ;;  %v1390_v14 = vpack.c.bf16 %v68_v10, %v65_v9  ;;  %v74_v16 = vand.u32 4294901760, %v47_v12  ;;  %v80_v21 = vand.u32 4294901760, %v49_v18  ;;  %v51_v23 = vld [vmem:[#allocation2 + $0x48] sm:$0xff]  ;;  %v1406_v28 = vld [vmem:[#allocation2 + $0x50] sm:$0xff]  ;;  %v1414_v32 = vld [vmem:[#allocation2 + $0x58] sm:$0xff]  ;;  %s749_s1 = sshll.u32 %s1351_s0, 4  ;;  %s750_s1 = int_to_ptr.vmem [resolvable:$true] %s749_s1 }
  0x18   :  { %v1400_v24 = vsub.f32 %v44_v5, %v65_v9  ;;  %v1402_v25 = vsub.f32 %v45_v6, %v68_v10  ;;  %v83_v26 = vand.u32 4294901760, %v50_v22  ;;  %v86_v27 = vand.u32 4294901760, %v51_v23  ;;  %v1430_v41 = vld [vmem:[#allocation2 + $0x60] sm:$0xff]  ;;  %v1434_v44 = vld [vmem:[#allocation2 + $0x68] sm:$0xff]  ;;  %v1458_v58 = vld [vmem:[#allocation2 + $0x70] sm:$0xff]  ;;  %s1319_s27 = scalar_lea.vmem %s750_s1, 256  ;;  %p1324_p9 = scmp.lt.s32.totalorder %s750_s1, %s750_s1 }
  0x19   :  { %34 = vperm.xlu0 %1296, %v27_v7   ;;  %1184 = vmatprep.subr.bf16.mxu0 %v1388_v13  ;;  %v1398_v19 = vpack.c.bf16 %v74_v16, %v71_v15  ;;  %v1412_v31 = vpack.c.bf16 %v80_v21, %v77_v20  ;;  %v89_v36 = vand.u32 4294901760, %v1406_v28  ;;  %v1421_v37 = vsub.f32 %v46_v11, %v71_v15  ;;  %v57_v61 = vld [vmem:[#allocation2 + $0x78] sm:$0xff]  ;;  %p1320_p8 = scmp.ne.s32.totalorder %s750_s1, %s1319_s27  ;;  %p1325_p10 = scmp.lt.s32.totalorder %s1319_s27, %s1319_s27 }
  0x1a   :  { %1088 = vmatprep.subr.bf16.mxu1 %v1388_v13  ;;  %1186 = vmatpush3.bf16.msra.mxu0 %v1388_v13  ;;  %v176_v29 = vand.u32 4294901760, %v1400_v24  ;;  %v183_v30 = vand.u32 4294901760, %v1402_v25  ;;  %v1423_v38 = vsub.f32 %v47_v12, %v74_v16  ;;  %v1427_v39 = vpack.c.bf16 %v86_v27, %v83_v26 }
  0x1b   :  { %1090 = vmatpush3.bf16.msra.mxu1 %v1388_v13  ;;  %1188 = vmatprep.subr.bf16.mxu0 %v1390_v14  ;;  %v92_v40 = vand.u32 4294901760, %v1414_v32  ;;  %v1436_v45 = vsub.f32 %v42_v2, %v59_v4  ;;  %v190_v47 = vand.u32 4294901760, %v1421_v37  ;;  %v1444_v50 = vsub.f32 %v48_v17, %v77_v20  ;;  %p1326_p11 = por %p1325_p10, %p1324_p9 }
  0x1c   :  { %1092 = vmatprep.subr.bf16.mxu1 %v1390_v14  ;;  %v1416_v33 = vpack.c.bf16 %v183_v30, %v176_v29  ;;  %v177_v34 = vsub.f32 %v1400_v24, %v176_v29  ;;  %v184_v35 = vsub.f32 %v1402_v25, %v183_v30  ;;  %v197_v48 = vand.u32 4294901760, %v1423_v38 }
  0x1d   :  { %v1446_v51 = vsub.f32 %v49_v18, %v80_v21  ;;  %v95_v52 = vand.u32 4294901760, %v1430_v41  ;;  %v191_v54 = vsub.f32 %v1421_v37, %v190_v47  ;;  %v1455_v56 = vpack.c.bf16 %v92_v40, %v89_v36  ;;  %p1327_p12 = pnand %p1326_p11, %p1320_p8 }
  0x1e   :  { %1190 = vmatpush3.bf16.msra.mxu0 %v1390_v14  ;;  %v178_v42 = vand.u32 4294901760, %v177_v34  ;;  %v185_v43 = vand.u32 4294901760, %v184_v35  ;;  %v1449_v53 = vpack.c.bf16 %v197_v48, %v190_v47  ;;  %v198_v55 = vsub.f32 %v1423_v38, %v197_v48 }
  0x1f   :  { %1094 = vmatpush3.bf16.msra.mxu1 %v1390_v14  ;;  %1192 = vmatprep.subr.bf16.mxu0 %v1398_v19  ;;  %v98_v57 = vand.u32 4294901760, %v1434_v44  ;;  %v204_v59 = vand.u32 4294901760, %v1444_v50  ;;  %v211_v60 = vand.u32 4294901760, %v1446_v51  ;;  %v162_v62 = vand.u32 4294901760, %v1436_v45 }
  0x20   :  { %1096 = vmatprep.subr.bf16.mxu1 %v1398_v19  ;;  %v1442_v49 = vpack.c.bf16 %v185_v43, %v178_v42  ;;  %v169_v63 = vand.u32 4294901760, %v1438_v46  ;;  %v192_v0 = vand.u32 4294901760, %v191_v54  ;;  %v199_v1 = vand.u32 4294901760, %v198_v55 }
  0x21   :  { %v1466_v2 = vpack.c.bf16 %v211_v60, %v204_v59  ;;  %v205_v3 = vsub.f32 %v1444_v50, %v204_v59  ;;  %v212_v4 = vsub.f32 %v1446_v51, %v211_v60  ;;  %v1470_v5 = vsub.f32 %v50_v22, %v83_v26 }
  0x22   :  { %1194 = vmatpush3.bf16.msra.mxu0 %v1398_v19  ;;  %v101_v6 = vand.u32 4294901760, %v1458_v58  ;;  %v1473_v7 = vpack.c.bf16 %v199_v1, %v192_v0  ;;  %v1475_v8 = vsub.f32 %v51_v23, %v86_v27  ;;  %v104_v9 = vand.u32 4294901760, %v57_v61 }
  0x23   :  { %1098 = vmatpush3.bf16.msra.mxu1 %v1398_v19  ;;  %1196 = vmatprep.subr.bf16.mxu0 %v1412_v31  ;;  %v206_v10 = vand.u32 4294901760, %v205_v3  ;;  %v213_v11 = vand.u32 4294901760, %v212_v4  ;;  %v218_v12 = vand.u32 4294901760, %v1470_v5  ;;  %v1482_v15 = vpack.c.bf16 %v98_v57, %v95_v52 }
  0x24   :  { %1100 = vmatprep.subr.bf16.mxu1 %v1412_v31  ;;  %v163_v16 = vsub.f32 %v1436_v45, %v162_v62  ;;  %v170_v17 = vsub.f32 %v1438_v46, %v169_v63  ;;  %v225_v18 = vand.u32 4294901760, %v1475_v8  ;;  %v231_v22 = vsub.f32 %v1406_v28, %v89_v36 }
  0x25   :  { %v1487_v20 = vpack.c.bf16 %v213_v11, %v206_v10  ;;  %v219_v21 = vsub.f32 %v1470_v5, %v218_v12  ;;  %v238_v23 = vsub.f32 %v1414_v32, %v92_v40  ;;  %v1499_v35 = vpack.c.bf16 %v104_v9, %v101_v6 }
  0x26   :  { %1198 = vmatpush3.bf16.msra.mxu0 %v1412_v31  ;;  %v1492_v26 = vpack.c.bf16 %v225_v18, %v218_v12  ;;  %v226_v27 = vsub.f32 %v1475_v8, %v225_v18  ;;  %v232_v30 = vand.u32 4294901760, %v231_v22  ;;  %v164_v28 = vand.u32 4294901760, %v163_v16 }
  0x27   :  { %1102 = vmatpush3.bf16.msra.mxu1 %v1412_v31  ;;  %1200 = vmatprep.subr.bf16.mxu0 %v1427_v39  ;;  %v220_v29 = vand.u32 4294901760, %v219_v21  ;;  %v239_v34 = vand.u32 4294901760, %v238_v23  ;;  %v171_v36 = vand.u32 4294901760, %v170_v17  ;;  %v245_v47 = vsub.f32 %v1430_v41, %v95_v52 }
  0x28   :  { %1104 = vmatprep.subr.bf16.mxu1 %v1427_v39  ;;  %v227_v32 = vand.u32 4294901760, %v226_v27  ;;  %v233_v42 = vsub.f32 %v231_v22, %v232_v30  ;;  %v252_v54 = vsub.f32 %v1434_v44, %v98_v57  ;;  %v1215_v0 = vpack.c.bf16 %v169_v63, %v162_v62 }
  0x29   :  { %v1501_v40 = vpack.c.bf16 %v239_v34, %v232_v30  ;;  %v240_v43 = vsub.f32 %v238_v23, %v239_v34  ;;  %v246_v60 = vand.u32 4294901760, %v245_v47  ;;  %v1119_v1 = vpack.c.bf16 %v171_v36, %v164_v28 }
  0x2a   :  { %1202 = vmatpush3.bf16.msra.mxu0 %v1427_v39  ;;  %v1504_v48 = vpack.c.bf16 %v227_v32, %v220_v29  ;;  %v234_v55 = vand.u32 4294901760, %v233_v42  ;;  %v253_v3 = vand.u32 4294901760, %v252_v54  ;;  %v259_v52 = vsub.f32 %v1458_v58, %v101_v6 }
  0x2b   :  { %1106 = vmatpush3.bf16.msra.mxu1 %v1427_v39  ;;  %1204 = vmatprep.subr.bf16.mxu0 %v1455_v56  ;;  %v241_v59 = vand.u32 4294901760, %v240_v43  ;;  %v247_v41 = vsub.f32 %v245_v47, %v246_v60  ;;  %v266_v44 = vsub.f32 %v57_v61, %v104_v9  ;;  %v1524_v9 = vpack.c.bf16 %v1438_v46, %v1436_v45 }
  0x2c   :  { %1108 = vmatprep.subr.bf16.mxu1 %v1455_v56  ;;  %v1514_v57 = vpack.c.bf16 %v253_v3, %v246_v60  ;;  %v254_v10 = vsub.f32 %v252_v54, %v253_v3  ;;  %v260_v12 = vand.u32 4294901760, %v259_v52  ;;  %v1528_v27 = vpack.c.bf16 %v1402_v25, %v1400_v24 }
  0x2d   :  { %v1511_v4 = vpack.c.bf16 %v241_v59, %v234_v55  ;;  %v248_v11 = vand.u32 4294901760, %v247_v41  ;;  %v267_v16 = vand.u32 4294901760, %v266_v44  ;;  %v1532_v29 = vpack.c.bf16 %v1423_v38, %v1421_v37 }
  0x2e   :  { %1206 = vmatpush3.bf16.msra.mxu0 %v1455_v56  ;;  %v255_v62 = vand.u32 4294901760, %v254_v10  ;;  %v261_v17 = vsub.f32 %v259_v52, %v260_v12  ;;  %v1536_v30 = vpack.c.bf16 %v1446_v51, %v1444_v50  ;;  %v1540_v34 = vpack.c.bf16 %v1475_v8, %v1470_v5 }
  0x2f   :  { %1110 = vmatpush3.bf16.msra.mxu1 %v1455_v56  ;;  %1208 = vmatprep.subr.bf16.mxu0 %v1482_v15  ;;  %v1518_v63 = vpack.c.bf16 %v267_v16, %v260_v12  ;;  %v268_v18 = vsub.f32 %v266_v44, %v267_v16  ;;  %v1542_v28 = vpack.c.bf16 %v238_v23, %v231_v22  ;;  %v28_v24 = vlaneseq }
  0x30   :  { %1112 = vmatprep.subr.bf16.mxu1 %v1482_v15  ;;  %v1143_v21 = vpack.c.bf16 %v255_v62, %v248_v11  ;;  %v262_v58 = vand.u32 4294901760, %v261_v17  ;;  %v1544_v45 = vpack.c.bf16 %v252_v54, %v245_v47  ;;  %v1546_v46 = vpack.c.bf16 %v266_v44, %v259_v52 }
  0x31   :  { %v269_v61 = vand.u32 4294901760, %v268_v18  ;;  %v1548_v25 = vand.u32 127, %v28_v24  ;;  %v1349_v37 = vmov 0.0   ;;  %v1350_v47 = vmov 1.0  }
  0x32   :  { %1210 = vmatpush3.bf16.msra.mxu0 %v1482_v15 }
  0x33   :  { %1114 = vmatpush3.bf16.msra.mxu1 %v1482_v15  ;;  %1212 = vmatprep.subr.bf16.mxu0 %v1499_v35  ;;  %v1520_v6 = vpack.c.bf16 %v269_v61, %v262_v58 }
  0x34   :  { %1116 = vmatprep.subr.bf16.mxu1 %v1499_v35 }
  0x36   :  { %1214 = vmatpush3.bf16.msra.mxu0 %v1499_v35 }
  0x37   :  { %1118 = vmatpush3.bf16.msra.mxu1 %v1499_v35  ;;  %1216 = vmatprep.subr.bf16.mxu0 %v1215_v0 }
  0x38   :  { %1120 = vmatprep.subr.bf16.mxu1 %v1119_v1 }
  0x94   :  { %v32_v36 = vpop.permute.xlu0 %31 }
  0x95   :  { %vm36_vm0 = vcmp.eq.s32.totalorder %v1548_v25, %v32_v36 }
  0x96   :  { %v761_v38 = vsel %vm36_vm0, 1.0, %v1349_v37 }
  0x97   :  { %v140_v50 = vsub.f32 %v761_v38, %v761_v38 }
  0x98   :  { %v1553_v51 = vpop.permute.xlu0 %34 }
  0x99   :  { %vm37_vm1 = vcmp.eq.s32.totalorder %v1548_v25, %v1553_v51  ;;  %v141_v5 = vand.u32 4294901760, %v140_v50 }
  0x9a   :  { %v762_v8 = vsel %vm37_vm1, 1.0, %v1349_v37 }
  0x9b   :  { %v1560_v22 = vsub.f32 %v762_v8, %v762_v8  ;;  %1014 = vmatprep.mubr.f32.mxu0 %v141_v5  ;;  %v142_v23 = vsub.f32 %v140_v50, %v141_v5 }
  0x9d   :  { %v143_v32 = vand.u32 4294901760, %v142_v23  ;;  %v151_v42 = vand.u32 4294901760, %v1560_v22 }
  0x9f   :  { %909 = vmatprep.mubr.f32.mxu1 %v143_v32  ;;  %1015 = vmatmul.mubr.f32.vlgmr.msra.gmra.mrb[0].mxu0 %v151_v42  ;;  %v152_v43 = vsub.f32 %v1560_v22, %v151_v42 }
  0xa0   :  { %1218 = vmatpush3.bf16.msra.mxu0 %v1215_v0  ;;  %1049 = vmatprep.mubr.msk.f32.mxu0 %vm36_vm0, %v1350_v47 }
  0xa1   :  { %1220 = vmatprep.subr.bf16.mxu0 %v1416_v33  ;;  %v153_v54 = vand.u32 4294901760, %v152_v43 }
  0xa3   :  { %910 = vmatmul.mubr.f32.vlgmr.msra.gmra.mrb[0].mxu1 %v153_v54 }
  0xa4   :  { %1122 = vmatpush3.bf16.msra.mxu1 %v1119_v1  ;;  %1222 = vmatpush3.bf16.msra.mxu0 %v1416_v33 }
  0xa5   :  { %944 = vmatprep.mubr.msk.f32.mxu1 %vm36_vm0, %v1350_v47  ;;  %1124 = vmatprep.subr.bf16.mxu1 %v1442_v49 }
  0xa6   :  { %1224 = vmatprep.subr.bf16.mxu0 %v1449_v53 }
  0xa8   :  { %1126 = vmatpush3.bf16.msra.mxu1 %v1442_v49  ;;  %1226 = vmatpush3.bf16.msra.mxu0 %v1449_v53 }
  0xa9   :  { %1128 = vmatprep.subr.bf16.mxu1 %v1473_v7  ;;  %1228 = vmatprep.subr.bf16.mxu0 %v1466_v2 }
  0xac   :  { %1130 = vmatpush3.bf16.msra.mxu1 %v1473_v7  ;;  %1230 = vmatpush3.bf16.msra.mxu0 %v1466_v2 }
  0xad   :  { %1132 = vmatprep.subr.bf16.mxu1 %v1487_v20  ;;  %1232 = vmatprep.subr.bf16.mxu0 %v1492_v26 }
  0xb0   :  { %1134 = vmatpush3.bf16.msra.mxu1 %v1487_v20  ;;  %1234 = vmatpush3.bf16.msra.mxu0 %v1492_v26 }
  0xb1   :  { %1136 = vmatprep.subr.bf16.mxu1 %v1504_v48  ;;  %1236 = vmatprep.subr.bf16.mxu0 %v1501_v40 }
  0xb4   :  { %1138 = vmatpush3.bf16.msra.mxu1 %v1504_v48  ;;  %1238 = vmatpush3.bf16.msra.mxu0 %v1501_v40 }
  0xb5   :  { %1140 = vmatprep.subr.bf16.mxu1 %v1511_v4  ;;  %1240 = vmatprep.subr.bf16.mxu0 %v1514_v57 }
  0xb8   :  { %1142 = vmatpush3.bf16.msra.mxu1 %v1511_v4  ;;  %1242 = vmatpush3.bf16.msra.mxu0 %v1514_v57 }
  0xb9   :  { %1144 = vmatprep.subr.bf16.mxu1 %v1143_v21  ;;  %1244 = vmatprep.subr.bf16.mxu0 %v1518_v63 }
  0xbc   :  { %1146 = vmatpush3.bf16.msra.mxu1 %v1143_v21  ;;  %1246 = vmatpush3.bf16.msra.mxu0 %v1518_v63 }
  0xbd   :  { %1148 = vmatprep.subr.bf16.mxu1 %v1520_v6  ;;  %1248 = vmatprep.subr.bf16.mxu0 %v1388_v13 }
  0xbf   :  { %1050 = vmatmul.mubr.msk.f32.vlgmr.msra.gmra.mrb[0].mxu0 %vm37_vm1, %v1350_v47 }
  0xc0   :  { %1150 = vmatpush3.bf16.msra.mxu1 %v1520_v6  ;;  %1250 = vmatpush3.bf16.msra.mxu0 %v1388_v13 }
  0xc1   :  { %1084 = vmatprep.mubr.msk.f32.mxu0 %vm36_vm0, %v1350_v47  ;;  %1152 = vmatprep.subr.bf16.mxu1 %v1524_v9 }
  0xc2   :  { %1252 = vmatprep.subr.bf16.mxu0 %v1390_v14 }
  0xc3   :  { %945 = vmatmul.mubr.msk.f32.vlgmr.msra.gmra.mrb[0].mxu1 %vm37_vm1, %v1350_v47 }
  0xc4   :  { %1154 = vmatpush3.bf16.msra.mxu1 %v1524_v9  ;;  %979 = vmatprep.mubr.f32.mxu1 %v140_v50 }
  0xc5   :  { %1254 = vmatpush3.bf16.msra.mxu0 %v1390_v14  ;;  %1156 = vmatprep.subr.bf16.mxu1 %v1528_v27 }
  0xc6   :  { %1256 = vmatprep.subr.bf16.mxu0 %v1398_v19 }
  0xc8   :  { %1158 = vmatpush3.bf16.msra.mxu1 %v1528_v27 }
  0xc9   :  { %1258 = vmatpush3.bf16.msra.mxu0 %v1398_v19  ;;  %1160 = vmatprep.subr.bf16.mxu1 %v1532_v29 }
  0xca   :  { %1260 = vmatprep.subr.bf16.mxu0 %v1412_v31 }
  0xcc   :  { %1162 = vmatpush3.bf16.msra.mxu1 %v1532_v29 }
  0xcd   :  { %1262 = vmatpush3.bf16.msra.mxu0 %v1412_v31  ;;  %1164 = vmatprep.subr.bf16.mxu1 %v1536_v30 }
  0xce   :  { %1264 = vmatprep.subr.bf16.mxu0 %v1427_v39 }
  0xd0   :  { %1166 = vmatpush3.bf16.msra.mxu1 %v1536_v30 }
  0xd1   :  { %1266 = vmatpush3.bf16.msra.mxu0 %v1427_v39  ;;  %1168 = vmatprep.subr.bf16.mxu1 %v1540_v34 }
  0xd2   :  { %1268 = vmatprep.subr.bf16.mxu0 %v1455_v56 }
  0xd4   :  { %1170 = vmatpush3.bf16.msra.mxu1 %v1540_v34 }
  0xd5   :  { %1270 = vmatpush3.bf16.msra.mxu0 %v1455_v56  ;;  %1172 = vmatprep.subr.bf16.mxu1 %v1542_v28 }
  0xd6   :  { %1272 = vmatprep.subr.bf16.mxu0 %v1482_v15 }
  0xd8   :  { %1174 = vmatpush3.bf16.msra.mxu1 %v1542_v28 }
  0xd9   :  { %1274 = vmatpush3.bf16.msra.mxu0 %v1482_v15  ;;  %1176 = vmatprep.subr.bf16.mxu1 %v1544_v45 }
  0xda   :  { %1276 = vmatprep.subr.bf16.mxu0 %v1499_v35 }
  0xdc   :  { %1178 = vmatpush3.bf16.msra.mxu1 %v1544_v45 }
  0xdd   :  { %1278 = vmatpush3.bf16.msra.mxu0 %v1499_v35  ;;  %1180 = vmatprep.subr.bf16.mxu1 %v1546_v46 }
  0xe0   :  { %1085 = vmatmul.mubr.msk.f32.vlgmr.msra.gmra.mrb[0].mxu0 %vm37_vm1, %v1350_v47  ;;  %1182 = vmatpush3.bf16.msra.mxu1 %v1546_v46 }
  0xe3   :  { %980 = vmatmul.mubr.f32.vlgmr.msra.gmra.mrb[0].mxu1 %v1560_v22 }
 0x1b3   :  { %v1086_v13 = vpop.f32.mrb[0].mxu0 }
 0x1b4   :  { %v732_v14 = vpop.f32.mrb[1].mxu0 }
 0x1b6   :  { %v981_v19 = vpop.f32.mrb[0].mxu1 }
 0x1b7   :  { %v1279_v31 = vadd.f32 %v1086_v13, %v981_v19  ;;  %v416_v33 = vpop.f32.mrb[1].mxu1 }
 0x1b8   :  { %v1280_v39 = vadd.f32 %v732_v14, %v416_v33 }
 0x1b9   :  { %743 = vst [vmem:[#allocation5 + $0x8] sm:$0xff] %v1279_v31 }
 0x1ba   :  { %742 = vst [vmem:[#allocation5] sm:$0xff] %v1280_v39 }
 0x1bb   :  { %1330 = shalt.err (!%p1327_p12)
}
 0x1bc   :  { %s1331_s30 = scalar_lea.hbm %s1661_s2, 256 }
 0x1bd   :  { %p1332_p13 = scmp.ne.s32.totalorder %s1661_s2, %s1331_s30  ;;  %p1335_p0 = scmp.lt.u32.totalorder %s1331_s30, %s1661_s2 }
 0x1bf   :  { %p1337_p1 = pnand %p1335_p0, %p1332_p13 }
 0x1c1   :  { %1340 = shalt.err (!%p1337_p1)
}
 0x1c2   :  { %755 = dma.vmem_to_hbm [thread:$0]  %s750_s1, 256, %s1661_s2, [#allocation4], %s1346_s19, %s1346_s19, %s1347_s20  }
 0x1c3   :  { %1343 = dma.done.wait [#allocation4], 256  }
 0x1c4   :  { %1344 = vsyncadd [#allocation4], 4294967040 }
 0x1c5   :  { %759 = vsyncpa [#allocation3], 1 }
 0x1c6   :  { %760 = vsyncpa [#allocation4], 1 }

// kernel: tpu_custom_call.1
= control target key start
LH: loop header
LB: loop body
LE: loop exit
PB: predicated region body
PF: predicated region fallthrough
CT: control target
= control target key end

     0   :  { %7 = vsyncpa [#allocation3], 0  ;;  %s1659_s0 = inlined_call_operand.vmem [shape: s32[16,1], index: 0, kind: input, shape index: {}]   ;;  %s1660_s1 = inlined_call_operand.hbm [shape: f32[128,128], index: 1, kind: input, shape index: {}]   ;;  %s1661_s2 = inlined_call_operand.hbm [shape: f32[16,128], index: 2, kind: output, shape index: {}]  }
   0x1   :  { %8 = vsyncpa [#allocation4], 0  ;;  %s1345_s9 = smov [#allocation2]   ;;  %s1297_s13 = scalar_lea.hbm %s1660_s1, 2048 }
   0x2   :  { %s16_s10 = sshll.u32 %s1345_s9, 4  ;;  %p1298_p0 = scmp.ne.s32.totalorder %s1660_s1, %s1297_s13  ;;  %s17_s10 = int_to_ptr.vmem [resolvable:$true] %s16_s10 }
   0x3   :  { %p1301_p1 = scmp.lt.u32.totalorder %s1297_s13, %s1660_s1 }
   0x5   :  { %p1303_p2 = pnand %p1301_p1, %p1298_p0 }
   0x7   :  { %1306 = shalt.err (!%p1303_p2)
}
   0x8   :  { %s1307_s18 = scalar_lea.vmem %s17_s10, 2048  ;;  %p1312_p4 = scmp.lt.s32.totalorder %s17_s10, %s17_s10 }
   0x9   :  { %p1308_p3 = scmp.ne.s32.totalorder %s17_s10, %s1307_s18  ;;  %p1313_p5 = scmp.lt.s32.totalorder %s1307_s18, %s1307_s18 }
   0xb   :  { %p1314_p6 = por %p1313_p5, %p1312_p4 }
   0xd   :  { %p1315_p7 = pnand %p1314_p6, %p1308_p3 }
   0xf   :  { %1318 = shalt.err (!%p1315_p7)
}
  0x10   :  { %s1346_s19 = smov 128   ;;  %s1347_s20 = smov 8  }
  0x11   :  { %22 = dma.hbm_to_vmem [thread:$0]  %s1660_s1, 2048, %s17_s10, [#allocation3], %s1346_s19, %s1346_s19, %s1347_s20  }
  0x12   :  { %1341 = dma.done.wait [#allocation3], 2048  }
  0x13   :  { %1342 = vsyncadd [#allocation3], 4294965248  ;;  %v1348_v0 = vmov 0   ;;  %v26_v1 = vld [vmem:[%s1659_s0] sm:$0xff]  ;;  %v43_v3 = vld [vmem:[#allocation2 + $0x8] sm:$0xff] }
  0x14   :  { %1296 = vset.pattern.permute.xlu0 %v1348_v0  ;;  %v42_v2 = vld [vmem:[#allocation2] sm:$0xff]  ;;  %v44_v5 = vld [vmem:[#allocation2 + $0x10] sm:$0xff]  ;;  %v45_v6 = vld [vmem:[#allocation2 + $0x18] sm:$0xff]  ;;  %v62_v8 = vand.u32 4294901760, %v43_v3 }
  0x15   :  { %31 = vperm.xlu0 %1296, %v26_v1   ;;  %v59_v4 = vand.u32 4294901760, %v42_v2  ;;  %v27_v7 = vld [vmem:[%s1659_s0 + $0x8] sm:$0xff]  ;;  %v65_v9 = vand.u32 4294901760, %v44_v5  ;;  %v68_v10 = vand.u32 4294901760, %v45_v6  ;;  %v46_v11 = vld [vmem:[#allocation2 + $0x20] sm:$0xff]  ;;  %v48_v17 = vld [vmem:[#allocation2 + $0x30] sm:$0xff] }
  0x16   :  { %v47_v12 = vld [vmem:[#allocation2 + $0x28] sm:$0xff]  ;;  %v71_v15 = vand.u32 4294901760, %v46_v11  ;;  %v49_v18 = vld [vmem:[#allocation2 + $0x38] sm:$0xff]  ;;  %v77_v20 = vand.u32 4294901760, %v48_v17  ;;  %v50_v22 = vld [vmem:[#allocation2 + $0x40] sm:$0xff]  ;;  %v1438_v46 = vsub.f32 %v43_v3, %v62_v8  ;;  %s1351_s0 = smov [#allocation5]  }
  0x17   :  { %v1388_v13 = vpack.c.bf16 %v62_v8, %v59_v4  ;;  %v1390_v14 = vpack.c.bf16 %v68_v10, %v65_v9  ;;  %v74_v16 = vand.u32 4294901760, %v47_v12  ;;  %v80_v21 = vand.u32 4294901760, %v49_v18  ;;  %v51_v23 = vld [vmem:[#allocation2 + $0x48] sm:$0xff]  ;;  %v1406_v28 = vld [vmem:[#allocation2 + $0x50] sm:$0xff]  ;;  %v1414_v32 = vld [vmem:[#allocation2 + $0x58] sm:$0xff]  ;;  %s749_s1 = sshll.u32 %s1351_s0, 4  ;;  %s750_s1 = int_to_ptr.vmem [resolvable:$true] %s749_s1 }
  0x18   :  { %v1400_v24 = vsub.f32 %v44_v5, %v65_v9  ;;  %v1402_v25 = vsub.f32 %v45_v6, %v68_v10  ;;  %v83_v26 = vand.u32 4294901760, %v50_v22  ;;  %v86_v27 = vand.u32 4294901760, %v51_v23  ;;  %v1430_v41 = vld [vmem:[#allocation2 + $0x60] sm:$0xff]  ;;  %v1434_v44 = vld [vmem:[#allocation2 + $0x68] sm:$0xff]  ;;  %v1458_v58 = vld [vmem:[#allocation2 + $0x70] sm:$0xff]  ;;  %s1319_s27 = scalar_lea.vmem %s750_s1, 256  ;;  %p1324_p9 = scmp.lt.s32.totalorder %s750_s1, %s750_s1 }
  0x19   :  { %34 = vperm.xlu0 %1296, %v27_v7   ;;  %1184 = vmatprep.subr.bf16.mxu0 %v1388_v13  ;;  %v1398_v19 = vpack.c.bf16 %v74_v16, %v71_v15  ;;  %v1412_v31 = vpack.c.bf16 %v80_v21, %v77_v20  ;;  %v89_v36 = vand.u32 4294901760, %v1406_v28  ;;  %v1421_v37 = vsub.f32 %v46_v11, %v71_v15  ;;  %v57_v61 = vld [vmem:[#allocation2 + $0x78] sm:$0xff]  ;;  %p1320_p8 = scmp.ne.s32.totalorder %s750_s1, %s1319_s27  ;;  %p1325_p10 = scmp.lt.s32.totalorder %s1319_s27, %s1319_s27 }
  0x1a   :  { %1088 = vmatprep.subr.bf16.mxu1 %v1388_v13  ;;  %1186 = vmatpush3.bf16.msra.mxu0 %v1388_v13  ;;  %v176_v29 = vand.u32 4294901760, %v1400_v24  ;;  %v183_v30 = vand.u32 4294901760, %v1402_v25  ;;  %v1423_v38 = vsub.f32 %v47_v12, %v74_v16  ;;  %v1427_v39 = vpack.c.bf16 %v86_v27, %v83_v26 }
  0x1b   :  { %1090 = vmatpush3.bf16.msra.mxu1 %v1388_v13  ;;  %1188 = vmatprep.subr.bf16.mxu0 %v1390_v14  ;;  %v92_v40 = vand.u32 4294901760, %v1414_v32  ;;  %v1436_v45 = vsub.f32 %v42_v2, %v59_v4  ;;  %v190_v47 = vand.u32 4294901760, %v1421_v37  ;;  %v1444_v50 = vsub.f32 %v48_v17, %v77_v20  ;;  %p1326_p11 = por %p1325_p10, %p1324_p9 }
  0x1c   :  { %1092 = vmatprep.subr.bf16.mxu1 %v1390_v14  ;;  %v1416_v33 = vpack.c.bf16 %v183_v30, %v176_v29  ;;  %v177_v34 = vsub.f32 %v1400_v24, %v176_v29  ;;  %v184_v35 = vsub.f32 %v1402_v25, %v183_v30  ;;  %v197_v48 = vand.u32 4294901760, %v1423_v38 }
  0x1d   :  { %v1446_v51 = vsub.f32 %v49_v18, %v80_v21  ;;  %v95_v52 = vand.u32 4294901760, %v1430_v41  ;;  %v191_v54 = vsub.f32 %v1421_v37, %v190_v47  ;;  %v1455_v56 = vpack.c.bf16 %v92_v40, %v89_v36  ;;  %p1327_p12 = pnand %p1326_p11, %p1320_p8 }
  0x1e   :  { %1190 = vmatpush3.bf16.msra.mxu0 %v1390_v14  ;;  %v178_v42 = vand.u32 4294901760, %v177_v34  ;;  %v185_v43 = vand.u32 4294901760, %v184_v35  ;;  %v1449_v53 = vpack.c.bf16 %v197_v48, %v190_v47  ;;  %v198_v55 = vsub.f32 %v1423_v38, %v197_v48 }
  0x1f   :  { %1094 = vmatpush3.bf16.msra.mxu1 %v1390_v14  ;;  %1192 = vmatprep.subr.bf16.mxu0 %v1398_v19  ;;  %v98_v57 = vand.u32 4294901760, %v1434_v44  ;;  %v204_v59 = vand.u32 4294901760, %v1444_v50  ;;  %v211_v60 = vand.u32 4294901760, %v1446_v51  ;;  %v162_v62 = vand.u32 4294901760, %v1436_v45 }
  0x20   :  { %1096 = vmatprep.subr.bf16.mxu1 %v1398_v19  ;;  %v1442_v49 = vpack.c.bf16 %v185_v43, %v178_v42  ;;  %v169_v63 = vand.u32 4294901760, %v1438_v46  ;;  %v192_v0 = vand.u32 4294901760, %v191_v54  ;;  %v199_v1 = vand.u32 4294901760, %v198_v55 }
  0x21   :  { %v1466_v2 = vpack.c.bf16 %v211_v60, %v204_v59  ;;  %v205_v3 = vsub.f32 %v1444_v50, %v204_v59  ;;  %v212_v4 = vsub.f32 %v1446_v51, %v211_v60  ;;  %v1470_v5 = vsub.f32 %v50_v22, %v83_v26 }
  0x22   :  { %1194 = vmatpush3.bf16.msra.mxu0 %v1398_v19  ;;  %v101_v6 = vand.u32 4294901760, %v1458_v58  ;;  %v1473_v7 = vpack.c.bf16 %v199_v1, %v192_v0  ;;  %v1475_v8 = vsub.f32 %v51_v23, %v86_v27  ;;  %v104_v9 = vand.u32 4294901760, %v57_v61 }
  0x23   :  { %1098 = vmatpush3.bf16.msra.mxu1 %v1398_v19  ;;  %1196 = vmatprep.subr.bf16.mxu0 %v1412_v31  ;;  %v206_v10 = vand.u32 4294901760, %v205_v3  ;;  %v213_v11 = vand.u32 4294901760, %v212_v4  ;;  %v218_v12 = vand.u32 4294901760, %v1470_v5  ;;  %v1482_v15 = vpack.c.bf16 %v98_v57, %v95_v52 }
  0x24   :  { %1100 = vmatprep.subr.bf16.mxu1 %v1412_v31  ;;  %v163_v16 = vsub.f32 %v1436_v45, %v162_v62  ;;  %v170_v17 = vsub.f32 %v1438_v46, %v169_v63  ;;  %v225_v18 = vand.u32 4294901760, %v1475_v8  ;;  %v231_v22 = vsub.f32 %v1406_v28, %v89_v36 }
  0x25   :  { %v1487_v20 = vpack.c.bf16 %v213_v11, %v206_v10  ;;  %v219_v21 = vsub.f32 %v1470_v5, %v218_v12  ;;  %v238_v23 = vsub.f32 %v1414_v32, %v92_v40  ;;  %v1499_v35 = vpack.c.bf16 %v104_v9, %v101_v6 }
  0x26   :  { %1198 = vmatpush3.bf16.msra.mxu0 %v1412_v31  ;;  %v1492_v26 = vpack.c.bf16 %v225_v18, %v218_v12  ;;  %v226_v27 = vsub.f32 %v1475_v8, %v225_v18  ;;  %v232_v30 = vand.u32 4294901760, %v231_v22  ;;  %v164_v28 = vand.u32 4294901760, %v163_v16 }
  0x27   :  { %1102 = vmatpush3.bf16.msra.mxu1 %v1412_v31  ;;  %1200 = vmatprep.subr.bf16.mxu0 %v1427_v39  ;;  %v220_v29 = vand.u32 4294901760, %v219_v21  ;;  %v239_v34 = vand.u32 4294901760, %v238_v23  ;;  %v171_v36 = vand.u32 4294901760, %v170_v17  ;;  %v245_v47 = vsub.f32 %v1430_v41, %v95_v52 }
  0x28   :  { %1104 = vmatprep.subr.bf16.mxu1 %v1427_v39  ;;  %v227_v32 = vand.u32 4294901760, %v226_v27  ;;  %v233_v42 = vsub.f32 %v231_v22, %v232_v30  ;;  %v252_v54 = vsub.f32 %v1434_v44, %v98_v57  ;;  %v1215_v0 = vpack.c.bf16 %v169_v63, %v162_v62 }
  0x29   :  { %v1501_v40 = vpack.c.bf16 %v239_v34, %v232_v30  ;;  %v240_v43 = vsub.f32 %v238_v23, %v239_v34  ;;  %v246_v60 = vand.u32 4294901760, %v245_v47  ;;  %v1119_v1 = vpack.c.bf16 %v171_v36, %v164_v28 }
  0x2a   :  { %1202 = vmatpush3.bf16.msra.mxu0 %v1427_v39  ;;  %v1504_v48 = vpack.c.bf16 %v227_v32, %v220_v29  ;;  %v234_v55 = vand.u32 4294901760, %v233_v42  ;;  %v253_v3 = vand.u32 4294901760, %v252_v54  ;;  %v259_v52 = vsub.f32 %v1458_v58, %v101_v6 }
  0x2b   :  { %1106 = vmatpush3.bf16.msra.mxu1 %v1427_v39  ;;  %1204 = vmatprep.subr.bf16.mxu0 %v1455_v56  ;;  %v241_v59 = vand.u32 4294901760, %v240_v43  ;;  %v247_v41 = vsub.f32 %v245_v47, %v246_v60  ;;  %v266_v44 = vsub.f32 %v57_v61, %v104_v9  ;;  %v1524_v9 = vpack.c.bf16 %v1438_v46, %v1436_v45 }
  0x2c   :  { %1108 = vmatprep.subr.bf16.mxu1 %v1455_v56  ;;  %v1514_v57 = vpack.c.bf16 %v253_v3, %v246_v60  ;;  %v254_v10 = vsub.f32 %v252_v54, %v253_v3  ;;  %v260_v12 = vand.u32 4294901760, %v259_v52  ;;  %v1528_v27 = vpack.c.bf16 %v1402_v25, %v1400_v24 }
  0x2d   :  { %v1511_v4 = vpack.c.bf16 %v241_v59, %v234_v55  ;;  %v248_v11 = vand.u32 4294901760, %v247_v41  ;;  %v267_v16 = vand.u32 4294901760, %v266_v44  ;;  %v1532_v29 = vpack.c.bf16 %v1423_v38, %v1421_v37 }
  0x2e   :  { %1206 = vmatpush3.bf16.msra.mxu0 %v1455_v56  ;;  %v255_v62 = vand.u32 4294901760, %v254_v10  ;;  %v261_v17 = vsub.f32 %v259_v52, %v260_v12  ;;  %v1536_v30 = vpack.c.bf16 %v1446_v51, %v1444_v50  ;;  %v1540_v34 = vpack.c.bf16 %v1475_v8, %v1470_v5 }
  0x2f   :  { %1110 = vmatpush3.bf16.msra.mxu1 %v1455_v56  ;;  %1208 = vmatprep.subr.bf16.mxu0 %v1482_v15  ;;  %v1518_v63 = vpack.c.bf16 %v267_v16, %v260_v12  ;;  %v268_v18 = vsub.f32 %v266_v44, %v267_v16  ;;  %v1542_v28 = vpack.c.bf16 %v238_v23, %v231_v22  ;;  %v28_v24 = vlaneseq }
  0x30   :  { %1112 = vmatprep.subr.bf16.mxu1 %v1482_v15  ;;  %v1143_v21 = vpack.c.bf16 %v255_v62, %v248_v11  ;;  %v262_v58 = vand.u32 4294901760, %v261_v17  ;;  %v1544_v45 = vpack.c.bf16 %v252_v54, %v245_v47  ;;  %v1546_v46 = vpack.c.bf16 %v266_v44, %v259_v52 }
  0x31   :  { %v269_v61 = vand.u32 4294901760, %v268_v18  ;;  %v1548_v25 = vand.u32 127, %v28_v24  ;;  %v1349_v37 = vmov 0.0   ;;  %v1350_v47 = vmov 1.0  }
  0x32   :  { %1210 = vmatpush3.bf16.msra.mxu0 %v1482_v15 }
  0x33   :  { %1114 = vmatpush3.bf16.msra.mxu1 %v1482_v15  ;;  %1212 = vmatprep.subr.bf16.mxu0 %v1499_v35  ;;  %v1520_v6 = vpack.c.bf16 %v269_v61, %v262_v58 }
  0x34   :  { %1116 = vmatprep.subr.bf16.mxu1 %v1499_v35 }
  0x36   :  { %1214 = vmatpush3.bf16.msra.mxu0 %v1499_v35 }
  0x37   :  { %1118 = vmatpush3.bf16.msra.mxu1 %v1499_v35  ;;  %1216 = vmatprep.subr.bf16.mxu0 %v1215_v0 }
  0x38   :  { %1120 = vmatprep.subr.bf16.mxu1 %v1119_v1 }
  0x94   :  { %v32_v36 = vpop.permute.xlu0 %31 }
  0x95   :  { %vm36_vm0 = vcmp.eq.s32.totalorder %v1548_v25, %v32_v36 }
  0x96   :  { %v761_v38 = vsel %vm36_vm0, 1.0, %v1349_v37 }
  0x97   :  { %v140_v50 = vsub.f32 %v761_v38, %v761_v38 }
  0x98   :  { %v1553_v51 = vpop.permute.xlu0 %34 }
  0x99   :  { %vm37_vm1 = vcmp.eq.s32.totalorder %v1548_v25, %v1553_v51  ;;  %v141_v5 = vand.u32 4294901760, %v140_v50 }
  0x9a   :  { %v762_v8 = vsel %vm37_vm1, 1.0, %v1349_v37 }
  0x9b   :  { %v1560_v22 = vsub.f32 %v762_v8, %v762_v8  ;;  %1014 = vmatprep.mubr.f32.mxu0 %v141_v5  ;;  %v142_v23 = vsub.f32 %v140_v50, %v141_v5 }
  0x9d   :  { %v143_v32 = vand.u32 4294901760, %v142_v23  ;;  %v151_v42 = vand.u32 4294901760, %v1560_v22 }
  0x9f   :  { %909 = vmatprep.mubr.f32.mxu1 %v143_v32  ;;  %1015 = vmatmul.mubr.f32.vlgmr.msra.gmra.mrb[0].mxu0 %v151_v42  ;;  %v152_v43 = vsub.f32 %v1560_v22, %v151_v42 }
  0xa0   :  { %1218 = vmatpush3.bf16.msra.mxu0 %v1215_v0  ;;  %1049 = vmatprep.mubr.msk.f32.mxu0 %vm36_vm0, %v1350_v47 }
  0xa1   :  { %1220 = vmatprep.subr.bf16.mxu0 %v1416_v33  ;;  %v153_v54 = vand.u32 4294901760, %v152_v43 }
  0xa3   :  { %910 = vmatmul.mubr.f32.vlgmr.msra.gmra.mrb[0].mxu1 %v153_v54 }
  0xa4   :  { %1122 = vmatpush3.bf16.msra.mxu1 %v1119_v1  ;;  %1222 = vmatpush3.bf16.msra.mxu0 %v1416_v33 }
  0xa5   :  { %944 = vmatprep.mubr.msk.f32.mxu1 %vm36_vm0, %v1350_v47  ;;  %1124 = vmatprep.subr.bf16.mxu1 %v1442_v49 }
  0xa6   :  { %1224 = vmatprep.subr.bf16.mxu0 %v1449_v53 }
  0xa8   :  { %1126 = vmatpush3.bf16.msra.mxu1 %v1442_v49  ;;  %1226 = vmatpush3.bf16.msra.mxu0 %v1449_v53 }
  0xa9   :  { %1128 = vmatprep.subr.bf16.mxu1 %v1473_v7  ;;  %1228 = vmatprep.subr.bf16.mxu0 %v1466_v2 }
  0xac   :  { %1130 = vmatpush3.bf16.msra.mxu1 %v1473_v7  ;;  %1230 = vmatpush3.bf16.msra.mxu0 %v1466_v2 }
  0xad   :  { %1132 = vmatprep.subr.bf16.mxu1 %v1487_v20  ;;  %1232 = vmatprep.subr.bf16.mxu0 %v1492_v26 }
  0xb0   :  { %1134 = vmatpush3.bf16.msra.mxu1 %v1487_v20  ;;  %1234 = vmatpush3.bf16.msra.mxu0 %v1492_v26 }
  0xb1   :  { %1136 = vmatprep.subr.bf16.mxu1 %v1504_v48  ;;  %1236 = vmatprep.subr.bf16.mxu0 %v1501_v40 }
  0xb4   :  { %1138 = vmatpush3.bf16.msra.mxu1 %v1504_v48  ;;  %1238 = vmatpush3.bf16.msra.mxu0 %v1501_v40 }
  0xb5   :  { %1140 = vmatprep.subr.bf16.mxu1 %v1511_v4  ;;  %1240 = vmatprep.subr.bf16.mxu0 %v1514_v57 }
  0xb8   :  { %1142 = vmatpush3.bf16.msra.mxu1 %v1511_v4  ;;  %1242 = vmatpush3.bf16.msra.mxu0 %v1514_v57 }
  0xb9   :  { %1144 = vmatprep.subr.bf16.mxu1 %v1143_v21  ;;  %1244 = vmatprep.subr.bf16.mxu0 %v1518_v63 }
  0xbc   :  { %1146 = vmatpush3.bf16.msra.mxu1 %v1143_v21  ;;  %1246 = vmatpush3.bf16.msra.mxu0 %v1518_v63 }
  0xbd   :  { %1148 = vmatprep.subr.bf16.mxu1 %v1520_v6  ;;  %1248 = vmatprep.subr.bf16.mxu0 %v1388_v13 }
  0xbf   :  { %1050 = vmatmul.mubr.msk.f32.vlgmr.msra.gmra.mrb[0].mxu0 %vm37_vm1, %v1350_v47 }
  0xc0   :  { %1150 = vmatpush3.bf16.msra.mxu1 %v1520_v6  ;;  %1250 = vmatpush3.bf16.msra.mxu0 %v1388_v13 }
  0xc1   :  { %1084 = vmatprep.mubr.msk.f32.mxu0 %vm36_vm0, %v1350_v47  ;;  %1152 = vmatprep.subr.bf16.mxu1 %v1524_v9 }
  0xc2   :  { %1252 = vmatprep.subr.bf16.mxu0 %v1390_v14 }
  0xc3   :  { %945 = vmatmul.mubr.msk.f32.vlgmr.msra.gmra.mrb[0].mxu1 %vm37_vm1, %v1350_v47 }
  0xc4   :  { %1154 = vmatpush3.bf16.msra.mxu1 %v1524_v9  ;;  %979 = vmatprep.mubr.f32.mxu1 %v140_v50 }
  0xc5   :  { %1254 = vmatpush3.bf16.msra.mxu0 %v1390_v14  ;;  %1156 = vmatprep.subr.bf16.mxu1 %v1528_v27 }
  0xc6   :  { %1256 = vmatprep.subr.bf16.mxu0 %v1398_v19 }
  0xc8   :  { %1158 = vmatpush3.bf16.msra.mxu1 %v1528_v27 }
  0xc9   :  { %1258 = vmatpush3.bf16.msra.mxu0 %v1398_v19  ;;  %1160 = vmatprep.subr.bf16.mxu1 %v1532_v29 }
  0xca   :  { %1260 = vmatprep.subr.bf16.mxu0 %v1412_v31 }
  0xcc   :  { %1162 = vmatpush3.bf16.msra.mxu1 %v1532_v29 }
  0xcd   :  { %1262 = vmatpush3.bf16.msra.mxu0 %v1412_v31  ;;  %1164 = vmatprep.subr.bf16.mxu1 %v1536_v30 }
  0xce   :  { %1264 = vmatprep.subr.bf16.mxu0 %v1427_v39 }
  0xd0   :  { %1166 = vmatpush3.bf16.msra.mxu1 %v1536_v30 }
  0xd1   :  { %1266 = vmatpush3.bf16.msra.mxu0 %v1427_v39  ;;  %1168 = vmatprep.subr.bf16.mxu1 %v1540_v34 }
  0xd2   :  { %1268 = vmatprep.subr.bf16.mxu0 %v1455_v56 }
  0xd4   :  { %1170 = vmatpush3.bf16.msra.mxu1 %v1540_v34 }
  0xd5   :  { %1270 = vmatpush3.bf16.msra.mxu0 %v1455_v56  ;;  %1172 = vmatprep.subr.bf16.mxu1 %v1542_v28 }
  0xd6   :  { %1272 = vmatprep.subr.bf16.mxu0 %v1482_v15 }
  0xd8   :  { %1174 = vmatpush3.bf16.msra.mxu1 %v1542_v28 }
  0xd9   :  { %1274 = vmatpush3.bf16.msra.mxu0 %v1482_v15  ;;  %1176 = vmatprep.subr.bf16.mxu1 %v1544_v45 }
  0xda   :  { %1276 = vmatprep.subr.bf16.mxu0 %v1499_v35 }
  0xdc   :  { %1178 = vmatpush3.bf16.msra.mxu1 %v1544_v45 }
  0xdd   :  { %1278 = vmatpush3.bf16.msra.mxu0 %v1499_v35  ;;  %1180 = vmatprep.subr.bf16.mxu1 %v1546_v46 }
  0xe0   :  { %1085 = vmatmul.mubr.msk.f32.vlgmr.msra.gmra.mrb[0].mxu0 %vm37_vm1, %v1350_v47  ;;  %1182 = vmatpush3.bf16.msra.mxu1 %v1546_v46 }
  0xe3   :  { %980 = vmatmul.mubr.f32.vlgmr.msra.gmra.mrb[0].mxu1 %v1560_v22 }
 0x1b3   :  { %v1086_v13 = vpop.f32.mrb[0].mxu0 }
 0x1b4   :  { %v732_v14 = vpop.f32.mrb[1].mxu0 }
 0x1b6   :  { %v981_v19 = vpop.f32.mrb[0].mxu1 }
 0x1b7   :  { %v1279_v31 = vadd.f32 %v1086_v13, %v981_v19  ;;  %v416_v33 = vpop.f32.mrb[1].mxu1 }
 0x1b8   :  { %v1280_v39 = vadd.f32 %v732_v14, %v416_v33 }
 0x1b9   :  { %743 = vst [vmem:[#allocation5 + $0x8] sm:$0xff] %v1279_v31 }
 0x1ba   :  { %742 = vst [vmem:[#allocation5] sm:$0xff] %v1280_v39 }
 0x1bb   :  { %1330 = shalt.err (!%p1327_p12)
}
 0x1bc   :  { %s1331_s30 = scalar_lea.hbm %s1661_s2, 256 }
 0x1bd   :  { %p1332_p13 = scmp.ne.s32.totalorder %s1661_s2, %s1331_s30  ;;  %p1335_p0 = scmp.lt.u32.totalorder %s1331_s30, %s1661_s2 }
 0x1bf   :  { %p1337_p1 = pnand %p1335_p0, %p1332_p13 }
 0x1c1   :  { %1340 = shalt.err (!%p1337_p1)
}
 0x1c2   :  { %755 = dma.vmem_to_hbm [thread:$0]  %s750_s1, 256, %s1661_s2, [#allocation4], %s1346_s19, %s1346_s19, %s1347_s20  }
 0x1c3   :  { %1343 = dma.done.wait [#allocation4], 256  }
 0x1c4   :  { %1344 = vsyncadd [#allocation4], 4294967040 }
 0x1c5   :  { %759 = vsyncpa [#allocation3], 1 }
 0x1c6   :  { %760 = vsyncpa [#allocation4], 1 }

</bundles_post_ra>
